<compile_context>
chip_gen: v7x
topology: tpu7x:2x2x1
jax: 0.10.0
libtpu: 0.0.40
codegen_flags: <defaults>
</compile_context>

<pallas_src>
import functools

import jax
import jax.numpy as jnp
from jax.experimental import pallas as pl
from jax.experimental.pallas import tpu as pltpu

BETA = 0.1
_NEG_BIG = -1e30  # bias padding for padded hidden columns -> exp() underflows to 0
# TODO(synk): nc.Softmax(beta=0.1, train=True) may make beta learnable; here it is a
# trace-time constant folded into the encoder weights — plumb it as an SMEM scalar
# if it must vary at runtime without re-tracing.


def _autoencoder_kernel(x_ref, we_ref, be_ref, wd_ref, bd_ref, out_ref, hid_ref,
                        *, compute_dtype, approx_recip):
    # Encoder: cast the x tile to the MXU dtype in-kernel (no extra HBM pass),
    # canonical (TB, V) x (V, H) matmul on the pre-transposed weight, f32 accumulate.
    # beta is already folded into we/be.
    x = x_ref[...].astype(compute_dtype)
    pre = jnp.dot(x, we_ref[...], preferred_element_type=jnp.float32) + be_ref[...]

    # Numerically-stable softmax over the hidden (lane) axis, in f32.
    z = pre - jnp.max(pre, axis=-1, keepdims=True)
    e = jnp.exp(z)
    denom = jnp.sum(e, axis=-1, keepdims=True)
    if approx_recip:
        hidden = e * pl.reciprocal(denom, approx=True)   # EUP slot, ~free
    else:
        hidden = e / denom                               # exact path (f32 compute)
    hid_ref[...] = hidden.astype(hid_ref.dtype)

    # Decoder: (TB, H) x (H, V) on the pre-transposed weight, f32 accumulate.
    out = jnp.dot(hidden.astype(wd_ref.dtype), wd_ref[...],
                  preferred_element_type=jnp.float32) + bd_ref[...]
    out_ref[...] = out.astype(out_ref.dtype)


def _round_up(a, m):
    return (a + m - 1) // m * m


def autoencoder_forward(x, w_enc, b_enc, w_dec, b_dec, *,
                        compute_dtype=jnp.bfloat16,
                        out_dtype=None, hidden_dtype=None,
                        block_b=1024):
    """x: (B, V). w_enc: (H, V), b_enc: (H,), w_dec: (V, H), b_dec: (V,)
    (PyTorch nn.Linear convention).  Returns (output (B, V), hidden (B, H)).
    MXU operands use `compute_dtype` with f32 accumulation; `out_dtype` /
    `hidden_dtype` default to x.dtype (pass jnp.bfloat16 to halve writeback)."""
    B, V = x.shape
    H = w_enc.shape[0]
    out_dtype = x.dtype if out_dtype is None else out_dtype
    hidden_dtype = out_dtype if hidden_dtype is None else hidden_dtype
    itemsz = lambda dt: jnp.dtype(dt).itemsize

    # ---- lane padding: outputs must be lane-dense (last dim % 128 == 0) ----
    Vp = _round_up(V, 128)
    Hp = _round_up(H, 128)

    # ---- one-time weight prep (amortized over the whole batch) ----
    f32 = jnp.float32
    we = (BETA * w_enc.astype(f32)).T                      # (V, H), beta folded
    be = (BETA * b_enc.astype(f32)).reshape(1, H)
    wd = w_dec.astype(f32).T                               # (H, V)
    bd = b_dec.astype(f32).reshape(1, V)
    if Vp != V or Hp != H:
        we = jnp.pad(we, ((0, Vp - V), (0, Hp - H)))
        # padded hidden columns: huge negative bias -> softmax probability 0
        be = jnp.pad(be, ((0, 0), (0, Hp - H)), constant_values=_NEG_BIG)
        wd = jnp.pad(wd, ((0, Hp - H), (0, Vp - V)))
        bd = jnp.pad(bd, ((0, 0), (0, Vp - V)))
    we = we.astype(compute_dtype)
    wd = wd.astype(compute_dtype)

    # x keeps its HBM dtype (kernel casts per tile); only lane-pad here.
    x_in = x if Vp == V else jnp.pad(x, ((0, 0), (0, Vp - V)))

    # ---- generation-aware VMEM budget & batch-tile sizing ----
    try:
        vmem_cap = int(pltpu.get_tpu_info().vmem_capacity_bytes)   # 128 MiB v5e/v6e, 64 MiB v7x
    except Exception:
        vmem_cap = 64 << 20                                        # conservative fallback
    budget = max(24 << 20, vmem_cap - (24 << 20))                  # leave compiler headroom

    x_it, c_it = itemsz(x.dtype), itemsz(compute_dtype)
    o_it, h_it = itemsz(out_dtype), itemsz(hidden_dtype)
    # weights/biases are double-buffered by the pipeline even though constant
    wgt_bytes = 2 * (2 * Vp * Hp * c_it) + 2 * (Hp + Vp) * 4

    def footprint(tb):
        act = 2 * tb * (Vp * x_it + Vp * o_it + Hp * h_it)         # double-buffered tiles
        interm = tb * (Vp * c_it + 4 * Hp * 4 + Hp * c_it)         # casts + softmax temps
        return wgt_bytes + act + interm + (2 << 20)

    SUB = 16  # sublane multiple covering f32 (8) and bf16 (16) second-minor dims
    TB = min(_round_up(block_b, SUB), _round_up(B, SUB))
    while TB > SUB and footprint(TB) > budget:
        TB = max(SUB, _round_up(TB // 2, SUB))

    Bp = _round_up(B, TB)
    if Bp != B:
        x_in = jnp.pad(x_in, ((0, Bp - B), (0, 0)))

    grid = (Bp // TB,)

    cost = pl.CostEstimate(
        flops=2 * 2 * Bp * Vp * Hp,                                 # encoder + decoder
        transcendentals=Bp * Hp,                                    # softmax exp
        bytes_accessed=(Bp * Vp * x_it + 2 * Hp * Vp * c_it + (Hp + Vp) * 4
                        + Bp * Vp * o_it + Bp * Hp * h_it),
    )

    kernel = functools.partial(
        _autoencoder_kernel,
        compute_dtype=compute_dtype,
        approx_recip=(jnp.dtype(compute_dtype) != jnp.dtype(jnp.float32)),
    )

    out, hidden = pl.pallas_call(
        kernel,
        out_shape=(
            jax.ShapeDtypeStruct((Bp, Vp), out_dtype),              # reconstruction
            jax.ShapeDtypeStruct((Bp, Hp), hidden_dtype),           # hidden code
        ),
        grid=grid,
        in_specs=[
            pl.BlockSpec((TB, Vp), lambda i: (i, 0)),               # x: streams over batch
            pl.BlockSpec((Vp, Hp), lambda i: (0, 0)),               # W_enc^T: VMEM resident
            pl.BlockSpec((1, Hp), lambda i: (0, 0)),                # b_enc (beta-scaled)
            pl.BlockSpec((Hp, Vp), lambda i: (0, 0)),               # W_dec^T: VMEM resident
            pl.BlockSpec((1, Vp), lambda i: (0, 0)),                # b_dec
        ],
        out_specs=(
            pl.BlockSpec((TB, Vp), lambda i: (i, 0)),
            pl.BlockSpec((TB, Hp), lambda i: (i, 0)),
        ),
        compiler_params=pltpu.CompilerParams(
            # TODO(synk): on v7x consider CORE_PARALLEL / core_map so a small batch
            # grid still splits across both TensorCores; "parallel" is kept here for
            # portability across generations and grid=(1,) cases.
            dimension_semantics=("parallel",),
            vmem_limit_bytes=int(budget),
        ),
        cost_estimate=cost,
    )(x_in, we, be, wd, bd)

    if Bp != B or Vp != V or Hp != H:
        out = out[:B, :V]
        hidden = hidden[:B, :H]
    return out, hidden


def _reference(x, w_enc, b_enc, w_dec, b_dec):
    pre = jnp.dot(x, w_enc.T, precision="highest") + b_enc
    z = BETA * pre
    z = z - jnp.max(z, axis=-1, keepdims=True)
    e = jnp.exp(z)
    hidden = e / jnp.sum(e, axis=-1, keepdims=True)
    out = jnp.dot(hidden, w_dec.T, precision="highest") + b_dec
    return out, hidden


if __name__ == "__main__":
    # Small shapes consistent with the module (hidden_size=100, MNIST-like visible
    # dim); intentionally NOT multiples of 128 so the lane-padding path is exercised.
    B, V, H = 10, 196, 100

    key = jax.random.PRNGKey(0)
    k_x, k_we, k_be, k_wd, k_bd = jax.random.split(key, 5)

    x = jax.random.uniform(k_x, (B, V), dtype=jnp.float32)

    # Deterministic PyTorch-Linear-style init: U(-1/sqrt(fan_in), 1/sqrt(fan_in))
    bound_e = 1.0 / jnp.sqrt(jnp.float32(V))
    bound_d = 1.0 / jnp.sqrt(jnp.float32(H))
    w_enc = jax.random.uniform(k_we, (H, V), jnp.float32, -bound_e, bound_e)
    b_enc = jax.random.uniform(k_be, (H,), jnp.float32, -bound_e, bound_e)
    w_dec = jax.random.uniform(k_wd, (V, H), jnp.float32, -bound_d, bound_d)
    b_dec = jax.random.uniform(k_bd, (V,), jnp.float32, -bound_d, bound_d)

    ref_out, ref_hidden = _reference(x, w_enc, b_enc, w_dec, b_dec)

    # 1) f32 compute path (exact softmax division): tight-ish tolerances.
    out32, hid32 = autoencoder_forward(x, w_enc, b_enc, w_dec, b_dec,
                                       compute_dtype=jnp.float32)
    out32 = jax.block_until_ready(out32)
    hid32 = jax.block_until_ready(hid32)
    assert out32.shape == (B, V) and hid32.shape == (B, H)
    assert jnp.allclose(out32, ref_out, atol=1e-3, rtol=1e-3), "f32 output mismatch"
    assert jnp.allclose(hid32, ref_hidden, atol=1e-4, rtol=1e-3), "f32 hidden mismatch"
    assert jnp.allclose(jnp.sum(hid32, axis=-1), 1.0, atol=1e-3), "softmax rows must sum to 1"

    # 2) default fast path (bf16 MXU operands, f32 accumulation, approx reciprocal).
    out_bf, hid_bf = autoencoder_forward(x, w_enc, b_enc, w_dec, b_dec)
    out_bf = jax.block_until_ready(out_bf)
    hid_bf = jax.block_until_ready(hid_bf)
    assert out_bf.shape == (B, V) and hid_bf.shape == (B, H)
    assert jnp.allclose(out_bf, ref_out, atol=2e-2, rtol=5e-2), "bf16 output mismatch"
    assert jnp.allclose(hid_bf, ref_hidden, atol=2e-3, rtol=5e-2), "bf16 hidden mismatch"

    # 3) reduced-writeback variant (bf16 stored outputs) — shape/dtype smoke test.
    out_lo, hid_lo = autoencoder_forward(x, w_enc, b_enc, w_dec, b_dec,
                                         out_dtype=jnp.bfloat16,
                                         hidden_dtype=jnp.bfloat16)
    out_lo = jax.block_until_ready(out_lo)
    hid_lo = jax.block_until_ready(hid_lo)
    assert out_lo.shape == (B, V) and out_lo.dtype == jnp.bfloat16
    assert hid_lo.shape == (B, H) and hid_lo.dtype == jnp.bfloat16

    print("KERNEL_OK")
</pallas_src>

<mosaic_0001>
module attributes {stable_mosaic.version = 11 : i64} {
  func.func @_autoencoder_kernel(%arg0: i32, %arg1: memref<16x256xf32, #tpu.memory_space<vmem>>, %arg2: memref<256x128xf32, #tpu.memory_space<vmem>>, %arg3: memref<1x128xf32, #tpu.memory_space<vmem>>, %arg4: memref<128x256xf32, #tpu.memory_space<vmem>>, %arg5: memref<1x256xf32, #tpu.memory_space<vmem>>, %arg6: memref<16x256xf32, #tpu.memory_space<vmem>>, %arg7: memref<16x128xf32, #tpu.memory_space<vmem>>) attributes {dimension_semantics = [#tpu.dimension_semantics<parallel>], iteration_bounds = array<i64: 1>, scalar_prefetch = 0 : i64, scratch_operands = 0 : i64, tpu.core_type = #tpu.core_type<tc>, window_params = [{transform_indices = @transform_0, window_bounds = array<i64: 16, 256>}, {pipeline_mode = #tpu.pipeline_mode<synchronous>, transform_indices = @transform_1, window_bounds = array<i64: 256, 128>}, {pipeline_mode = #tpu.pipeline_mode<synchronous>, transform_indices = @transform_2, window_bounds = array<i64: 1, 128>}, {pipeline_mode = #tpu.pipeline_mode<synchronous>, transform_indices = @transform_3, window_bounds = array<i64: 128, 256>}, {pipeline_mode = #tpu.pipeline_mode<synchronous>, transform_indices = @transform_4, window_bounds = array<i64: 1, 256>}, {transform_indices = @transform_5, window_bounds = array<i64: 16, 256>}, {transform_indices = @transform_6, window_bounds = array<i64: 16, 128>}]} {
    %c0 = arith.constant 0 : index
    %c0_0 = arith.constant 0 : index
    %0 = vector.load %arg1[%c0, %c0_0] : memref<16x256xf32, #tpu.memory_space<vmem>>, vector<16x256xf32>
    %c0_1 = arith.constant 0 : index
    %c0_2 = arith.constant 0 : index
    %1 = vector.load %arg2[%c0_1, %c0_2] : memref<256x128xf32, #tpu.memory_space<vmem>>, vector<256x128xf32>
    %cst = arith.constant dense<0.000000e+00> : vector<16x128xf32>
    %2 = tpu.matmul %0, %1, %cst {dimension_numbers = #tpu.dot_dimension_numbers<[1], [0], [0], [1], [0, 0, 1, 1], [], []>} : vector<16x256xf32>, vector<256x128xf32>, vector<16x128xf32> -> vector<16x128xf32>
    %c0_3 = arith.constant 0 : index
    %c0_4 = arith.constant 0 : index
    %3 = vector.load %arg3[%c0_3, %c0_4] : memref<1x128xf32, #tpu.memory_space<vmem>>, vector<1x128xf32>
    %4 = vector.broadcast %3 : vector<1x128xf32> to vector<16x128xf32>
    %5 = arith.addf %2, %4 : vector<16x128xf32>
    %cst_5 = arith.constant dense<0xFF800000> : vector<16xf32>
    %6 = vector.multi_reduction <maximumf>, %5, %cst_5 [1] : vector<16x128xf32> to vector<16xf32>
    %7 = vector.shape_cast %6 : vector<16xf32> to vector<16x1xf32>
    %8 = vector.broadcast %7 : vector<16x1xf32> to vector<16x128xf32>
    %9 = arith.subf %5, %8 : vector<16x128xf32>
    %10 = math.exp %9 : vector<16x128xf32>
    %cst_6 = arith.constant dense<0.000000e+00> : vector<16xf32>
    %11 = vector.multi_reduction <add>, %10, %cst_6 [1] : vector<16x128xf32> to vector<16xf32>
    %12 = vector.shape_cast %11 : vector<16xf32> to vector<16x1xf32>
    %13 = vector.broadcast %12 : vector<16x1xf32> to vector<16x128xf32>
    %14 = arith.divf %10, %13 : vector<16x128xf32>
    %c0_7 = arith.constant 0 : index
    %c0_8 = arith.constant 0 : index
    %15 = vector.load %arg7[%c0_7, %c0_8] : memref<16x128xf32, #tpu.memory_space<vmem>>, vector<16x128xf32>
    tpu.vector_store %arg7[%c0_7, %c0_8], %14 {strides = array<i32>} : memref<16x128xf32, #tpu.memory_space<vmem>>, vector<16x128xf32>,
    %c0_9 = arith.constant 0 : index
    %c0_10 = arith.constant 0 : index
    %16 = vector.load %arg4[%c0_9, %c0_10] : memref<128x256xf32, #tpu.memory_space<vmem>>, vector<128x256xf32>
    %cst_11 = arith.constant dense<0.000000e+00> : vector<16x256xf32>
    %17 = tpu.matmul %14, %16, %cst_11 {dimension_numbers = #tpu.dot_dimension_numbers<[1], [0], [0], [1], [0, 0, 1, 1], [], []>} : vector<16x128xf32>, vector<128x256xf32>, vector<16x256xf32> -> vector<16x256xf32>
    %c0_12 = arith.constant 0 : index
    %c0_13 = arith.constant 0 : index
    %18 = vector.load %arg5[%c0_12, %c0_13] : memref<1x256xf32, #tpu.memory_space<vmem>>, vector<1x256xf32>
    %19 = vector.broadcast %18 : vector<1x256xf32> to vector<16x256xf32>
    %20 = arith.addf %17, %19 : vector<16x256xf32>
    %c0_14 = arith.constant 0 : index
    %c0_15 = arith.constant 0 : index
    %21 = vector.load %arg6[%c0_14, %c0_15] : memref<16x256xf32, #tpu.memory_space<vmem>>, vector<16x256xf32>
    tpu.vector_store %arg6[%c0_14, %c0_15], %20 {strides = array<i32>} : memref<16x256xf32, #tpu.memory_space<vmem>>, vector<16x256xf32>,
    return
  }
  func.func @transform_0(%arg0: i32) -> (i32, i32) {
    %c0_i32 = arith.constant 0 : i32
    %c0_i32_0 = arith.constant 0 : i32
    return %arg0, %c0_i32 : i32, i32
  }
  func.func @transform_1(%arg0: i32) -> (i32, i32) {
    %c0_i32 = arith.constant 0 : i32
    %c0_i32_0 = arith.constant 0 : i32
    %c0_i32_1 = arith.constant 0 : i32
    return %c0_i32, %c0_i32_0 : i32, i32
  }
  func.func @transform_2(%arg0: i32) -> (i32, i32) {
    %c0_i32 = arith.constant 0 : i32
    %c0_i32_0 = arith.constant 0 : i32
    %c0_i32_1 = arith.constant 0 : i32
    return %c0_i32, %c0_i32_0 : i32, i32
  }
  func.func @transform_3(%arg0: i32) -> (i32, i32) {
    %c0_i32 = arith.constant 0 : i32
    %c0_i32_0 = arith.constant 0 : i32
    %c0_i32_1 = arith.constant 0 : i32
    return %c0_i32, %c0_i32_0 : i32, i32
  }
  func.func @transform_4(%arg0: i32) -> (i32, i32) {
    %c0_i32 = arith.constant 0 : i32
    %c0_i32_0 = arith.constant 0 : i32
    %c0_i32_1 = arith.constant 0 : i32
    return %c0_i32, %c0_i32_0 : i32, i32
  }
  func.func @transform_5(%arg0: i32) -> (i32, i32) {
    %c0_i32 = arith.constant 0 : i32
    %c0_i32_0 = arith.constant 0 : i32
    return %arg0, %c0_i32 : i32, i32
  }
  func.func @transform_6(%arg0: i32) -> (i32, i32) {
    %c0_i32 = arith.constant 0 : i32
    %c0_i32_0 = arith.constant 0 : i32
    return %arg0, %c0_i32 : i32, i32
  }
}

</mosaic_0001>

<bundles_post_ra>
// kernel: tpu_custom_call.1
= control target key start
LH: loop header
LB: loop body
LE: loop exit
PB: predicated region body
PF: predicated region fallthrough
CT: control target
= control target key end

     0   :  { %12 = vsyncpa [#allocation3], 0  ;;  %s727_s0 = inlined_call_operand.hbm [shape: f32[16,256], index: 0, kind: input, shape index: {}]   ;;  %s728_s1 = inlined_call_operand.hbm [shape: f32[256,128], index: 1, kind: input, shape index: {}]   ;;  %s729_s2 = inlined_call_operand.vmem [shape: f32[1,128], index: 2, kind: input, shape index: {}]   ;;  %s730_s3 = inlined_call_operand.hbm [shape: f32[128,256], index: 3, kind: input, shape index: {}]   ;;  %s731_s4 = inlined_call_operand.vmem [shape: f32[1,256], index: 4, kind: input, shape index: {}]   ;;  %s732_s5 = inlined_call_operand.hbm [shape: f32[16,256], index: 5, kind: output, shape index: {0}]   ;;  %s733_s6 = inlined_call_operand.hbm [shape: f32[16,128], index: 6, kind: output, shape index: {1}]  }
   0x1   :  { %13 = vsyncpa [#allocation6], 0 }
   0x2   :  { %14 = vsyncpa [#allocation4], 0 }
   0x3   :  { %15 = vsyncpa [#allocation10], 0  ;;  %s601_s21 = smov [#allocation5]   ;;  %s483_s25 = scalar_lea.hbm %s728_s1, 4096 }
   0x4   :  { %s33_s22 = sshll.u32 %s601_s21, 4  ;;  %p484_p0 = scmp.ne.s32.totalorder %s728_s1, %s483_s25  ;;  %s34_s22 = int_to_ptr.vmem [resolvable:$true] %s33_s22 }
   0x5   :  { %p487_p1 = scmp.lt.u32.totalorder %s483_s25, %s728_s1 }
   0x7   :  { %p489_p2 = pnand %p487_p1, %p484_p0 }
   0x9   :  { %492 = shalt.err (!%p489_p2)
}
   0xa   :  { %s493_s30 = scalar_lea.vmem %s34_s22, 4096  ;;  %p498_p4 = scmp.lt.s32.totalorder %s34_s22, %s34_s22 }
   0xb   :  { %p494_p3 = scmp.ne.s32.totalorder %s34_s22, %s493_s30  ;;  %p499_p5 = scmp.lt.s32.totalorder %s493_s30, %s493_s30 }
   0xd   :  { %p500_p6 = por %p499_p5, %p498_p4 }
   0xf   :  { %p501_p7 = pnand %p500_p6, %p494_p3 }
  0x11   :  { %504 = shalt.err (!%p501_p7)
}
  0x12   :  { %s602_s7 = smov 128   ;;  %s603_s8 = smov 8  }
  0x13   :  { %39 = dma.hbm_to_vmem [thread:$0]  %s728_s1, 4096, %s34_s22, [#allocation6], %s602_s7, %s602_s7, %s603_s8  }
  0x14   :  { %s604_s11 = smov [#allocation2]   ;;  %s505_s15 = scalar_lea.hbm %s727_s0, 512 }
  0x15   :  { %s21_s12 = sshll.u32 %s604_s11, 4  ;;  %p506_p8 = scmp.ne.s32.totalorder %s727_s0, %s505_s15  ;;  %s22_s12 = int_to_ptr.vmem [resolvable:$true] %s21_s12 }
  0x16   :  { %p509_p9 = scmp.lt.u32.totalorder %s505_s15, %s727_s0 }
  0x18   :  { %p511_p10 = pnand %p509_p9, %p506_p8 }
  0x1a   :  { %514 = shalt.err (!%p511_p10)
}
  0x1b   :  { %s515_s20 = scalar_lea.vmem %s22_s12, 512  ;;  %p520_p12 = scmp.lt.s32.totalorder %s22_s12, %s22_s12 }
  0x1c   :  { %p516_p11 = scmp.ne.s32.totalorder %s22_s12, %s515_s20  ;;  %p521_p13 = scmp.lt.s32.totalorder %s515_s20, %s515_s20 }
  0x1e   :  { %p522_p0 = por %p521_p13, %p520_p12 }
  0x20   :  { %p523_p1 = pnand %p522_p0, %p516_p11 }
  0x22   :  { %526 = shalt.err (!%p523_p1)
}
  0x23   :  { %s605_s1 = smov 256   ;;  %s606_s21 = smov 16  }
  0x24   :  { %27 = dma.hbm_to_vmem [thread:$0]  %s727_s0, 512, %s22_s12, [#allocation3], %s605_s1, %s605_s1, %s606_s21  }
  0x25   :  { %s607_s24 = smov [#allocation7]   ;;  %s527_s28 = scalar_lea.hbm %s730_s3, 4096 }
  0x26   :  { %s47_s25 = sshll.u32 %s607_s24, 4  ;;  %p528_p2 = scmp.ne.s32.totalorder %s730_s3, %s527_s28  ;;  %s48_s25 = int_to_ptr.vmem [resolvable:$true] %s47_s25 }
  0x27   :  { %p531_p3 = scmp.lt.u32.totalorder %s527_s28, %s730_s3 }
  0x29   :  { %p533_p4 = pnand %p531_p3, %p528_p2 }
  0x2b   :  { %536 = shalt.err (!%p533_p4)
}
  0x2c   :  { %s537_s11 = scalar_lea.vmem %s48_s25, 4096  ;;  %p542_p6 = scmp.lt.s32.totalorder %s48_s25, %s48_s25 }
  0x2d   :  { %p538_p5 = scmp.ne.s32.totalorder %s48_s25, %s537_s11  ;;  %p543_p7 = scmp.lt.s32.totalorder %s537_s11, %s537_s11 }
  0x2f   :  { %p544_p8 = por %p543_p7, %p542_p6 }
  0x31   :  { %p545_p9 = pnand %p544_p8, %p538_p5 }
  0x33   :  { %548 = shalt.err (!%p545_p9)
}
  0x34   :  { %53 = dma.hbm_to_vmem [thread:$0]  %s730_s3, 4096, %s48_s25, [#allocation6], %s605_s1, %s605_s1, %s606_s21  }
  0x35   :  { %593 = dma.done.wait [#allocation3], 512  }
  0x36   :  { %594 = vsyncadd [#allocation3], 4294966784 }
  0x37   :  { %595 = dma.done.wait [#allocation6], 8192  }
  0x38   :  { %596 = vsyncadd [#allocation6], 4294959104  ;;  %v85_v0 = vld [vmem:[#allocation5 + $0x80] sm:$0xff]  ;;  %v86_v1 = vld [vmem:[#allocation5 + $0x88] sm:$0xff] }
  0x39   :  { %v69_v2 = vld [vmem:[#allocation5] sm:$0xff]  ;;  %v401_v3 = vpack.c.bf16 %v86_v1, %v85_v0  ;;  %v70_v4 = vld [vmem:[#allocation5 + $0x8] sm:$0xff]  ;;  %v87_v5 = vld [vmem:[#allocation5 + $0x90] sm:$0xff] }
  0x3a   :  { %v88_v6 = vld [vmem:[#allocation5 + $0x98] sm:$0xff]  ;;  %v403_v7 = vpack.c.bf16 %v70_v4, %v69_v2  ;;  %v71_v9 = vld [vmem:[#allocation5 + $0x10] sm:$0xff]  ;;  %v89_v11 = vld [vmem:[#allocation5 + $0xa0] sm:$0xff] }
  0x3b   :  { %v405_v8 = vpack.c.bf16 %v88_v6, %v87_v5  ;;  %v72_v10 = vld [vmem:[#allocation5 + $0x18] sm:$0xff]  ;;  %402 = vmatprep.subr.bf16.mxu0 %v401_v3  ;;  %v90_v12 = vld [vmem:[#allocation5 + $0xa8] sm:$0xff]  ;;  %v73_v15 = vld [vmem:[#allocation5 + $0x20] sm:$0xff] }
  0x3c   :  { %404 = vmatpush3.bf16.msra.mxu0 %v403_v7  ;;  %v407_v13 = vpack.c.bf16 %v72_v10, %v71_v9  ;;  %v409_v14 = vpack.c.bf16 %v90_v12, %v89_v11  ;;  %v74_v16 = vld [vmem:[#allocation5 + $0x28] sm:$0xff]  ;;  %v91_v17 = vld [vmem:[#allocation5 + $0xb0] sm:$0xff]  ;;  %v92_v18 = vld [vmem:[#allocation5 + $0xb8] sm:$0xff] }
  0x3d   :  { %406 = vmatprep.subr.bf16.mxu0 %v405_v8  ;;  %v411_v19 = vpack.c.bf16 %v74_v16, %v73_v15  ;;  %v413_v20 = vpack.c.bf16 %v92_v18, %v91_v17  ;;  %v75_v21 = vld [vmem:[#allocation5 + $0x30] sm:$0xff]  ;;  %v76_v22 = vld [vmem:[#allocation5 + $0x38] sm:$0xff]  ;;  %v93_v23 = vld [vmem:[#allocation5 + $0xc0] sm:$0xff] }
  0x3e   :  { %v94_v24 = vld [vmem:[#allocation5 + $0xc8] sm:$0xff]  ;;  %v415_v26 = vpack.c.bf16 %v76_v22, %v75_v21  ;;  %v77_v28 = vld [vmem:[#allocation5 + $0x40] sm:$0xff]  ;;  %v95_v30 = vld [vmem:[#allocation5 + $0xd0] sm:$0xff] }
  0x3f   :  { %v66_v25 = vld [vmem:[#allocation2 + $0x8] sm:$0xff]  ;;  %v417_v27 = vpack.c.bf16 %v94_v24, %v93_v23  ;;  %v96_v31 = vld [vmem:[#allocation5 + $0xd8] sm:$0xff]  ;;  %v79_v34 = vld [vmem:[#allocation5 + $0x50] sm:$0xff] }
  0x40   :  { %408 = vmatpush3.bf16.msra.mxu0 %v407_v13  ;;  %172 = vmatprep.mubr.f32.mxu0 %v66_v25  ;;  %v78_v29 = vld [vmem:[#allocation5 + $0x48] sm:$0xff]  ;;  %v421_v33 = vpack.c.bf16 %v96_v31, %v95_v30  ;;  %v80_v35 = vld [vmem:[#allocation5 + $0x58] sm:$0xff]  ;;  %v97_v36 = vld [vmem:[#allocation5 + $0xe0] sm:$0xff] }
  0x41   :  { %410 = vmatprep.subr.bf16.mxu0 %v409_v14  ;;  %v419_v32 = vpack.c.bf16 %v78_v29, %v77_v28  ;;  %v98_v37 = vld [vmem:[#allocation5 + $0xe8] sm:$0xff]  ;;  %v423_v38 = vpack.c.bf16 %v80_v35, %v79_v34  ;;  %v81_v40 = vld [vmem:[#allocation5 + $0x60] sm:$0xff]  ;;  %v99_v42 = vld [vmem:[#allocation5 + $0xf0] sm:$0xff] }
  0x42   :  { %v425_v39 = vpack.c.bf16 %v98_v37, %v97_v36  ;;  %v82_v41 = vld [vmem:[#allocation5 + $0x68] sm:$0xff]  ;;  %v100_v43 = vld [vmem:[#allocation5 + $0xf8] sm:$0xff]  ;;  %v83_v46 = vld [vmem:[#allocation5 + $0x70] sm:$0xff] }
  0x43   :  { %v427_v44 = vpack.c.bf16 %v82_v41, %v81_v40  ;;  %v429_v45 = vpack.c.bf16 %v100_v43, %v99_v42  ;;  %v84_v47 = vld [vmem:[#allocation5 + $0x78] sm:$0xff]  ;;  %v65_v49 = vld [vmem:[#allocation2] sm:$0xff]  ;;  %v67_v51 = vld [vmem:[#allocation2 + $0x10] sm:$0xff] }
  0x44   :  { %412 = vmatpush3.bf16.msra.mxu0 %v411_v19  ;;  %v431_v48 = vpack.c.bf16 %v84_v47, %v83_v46  ;;  %v68_v50 = vld [vmem:[#allocation2 + $0x18] sm:$0xff]  ;;  %v362_v54 = vld [vmem:[%s729_s2] ss:$0 sm:$0xff]  ;;  %v204_v61 = vld [vmem:[#allocation7 + $0x8] sm:$0xff]  ;;  %s609_s2 = smov [#allocation9]  }
  0x45   :  { %414 = vmatprep.subr.bf16.mxu0 %v413_v20  ;;  %v206_v62 = vld [vmem:[#allocation7 + $0x18] sm:$0xff]  ;;  %v203_v63 = vld [vmem:[#allocation7] sm:$0xff]  ;;  %v205_v1 = vld [vmem:[#allocation7 + $0x10] sm:$0xff]  ;;  %s345_s14 = sshll.u32 %s609_s2, 4  ;;  %s346_s14 = int_to_ptr.vmem [resolvable:$true] %s345_s14 }
  0x46   :  { %v433_v0 = vpack.c.bf16 %v206_v62, %v204_v61  ;;  %v208_v2 = vld [vmem:[#allocation7 + $0x28] sm:$0xff]  ;;  %v210_v3 = vld [vmem:[#allocation7 + $0x38] sm:$0xff]  ;;  %v435_v4 = vpack.c.bf16 %v205_v1, %v203_v63  ;;  %v207_v6 = vld [vmem:[#allocation7 + $0x20] sm:$0xff]  ;;  %s549_s15 = scalar_lea.vmem %s346_s14, 256  ;;  %p554_p11 = scmp.lt.s32.totalorder %s346_s14, %s346_s14 }
  0x47   :  { %v437_v5 = vpack.c.bf16 %v210_v3, %v208_v2  ;;  %v209_v7 = vld [vmem:[#allocation7 + $0x30] sm:$0xff]  ;;  %v212_v8 = vld [vmem:[#allocation7 + $0x48] sm:$0xff]  ;;  %v214_v9 = vld [vmem:[#allocation7 + $0x58] sm:$0xff]  ;;  %p550_p10 = scmp.ne.s32.totalorder %s346_s14, %s549_s15  ;;  %p555_p12 = scmp.lt.s32.totalorder %s549_s15, %s549_s15 }
  0x48   :  { %416 = vmatpush3.bf16.msra.mxu0 %v415_v26  ;;  %434 = vmatprep.subr.bf16.mxu1 %v433_v0  ;;  %v439_v10 = vpack.c.bf16 %v209_v7, %v207_v6  ;;  %v441_v11 = vpack.c.bf16 %v214_v9, %v212_v8  ;;  %v211_v12 = vld [vmem:[#allocation7 + $0x40] sm:$0xff]  ;;  %v213_v13 = vld [vmem:[#allocation7 + $0x50] sm:$0xff]  ;;  %v216_v14 = vld [vmem:[#allocation7 + $0x68] sm:$0xff] }
  0x49   :  { %418 = vmatprep.subr.bf16.mxu0 %v417_v27  ;;  %436 = vmatpush1.bf16.msra.mxu1 %v435_v4  ;;  %v218_v15 = vld [vmem:[#allocation7 + $0x78] sm:$0xff]  ;;  %v443_v16 = vpack.c.bf16 %v213_v13, %v211_v12  ;;  %v215_v18 = vld [vmem:[#allocation7 + $0x60] sm:$0xff]  ;;  %v217_v19 = vld [vmem:[#allocation7 + $0x70] sm:$0xff]  ;;  %p556_p13 = por %p555_p12, %p554_p11 }
  0x4a   :  { %438 = vmatprep.subr.bf16.mxu1 %v437_v5  ;;  %v445_v17 = vpack.c.bf16 %v218_v15, %v216_v14  ;;  %v220_v20 = vld [vmem:[#allocation7 + $0x88] sm:$0xff]  ;;  %v222_v21 = vld [vmem:[#allocation7 + $0x98] sm:$0xff]  ;;  %v447_v22 = vpack.c.bf16 %v217_v19, %v215_v18  ;;  %v219_v24 = vld [vmem:[#allocation7 + $0x80] sm:$0xff] }
  0x4b   :  { %v449_v23 = vpack.c.bf16 %v222_v21, %v220_v20  ;;  %v221_v25 = vld [vmem:[#allocation7 + $0x90] sm:$0xff]  ;;  %v224_v35 = vld [vmem:[#allocation7 + $0xa8] sm:$0xff]  ;;  %v226_v36 = vld [vmem:[#allocation7 + $0xb8] sm:$0xff]  ;;  %p557_p0 = pnand %p556_p13, %p550_p10 }
  0x4c   :  { %420 = vmatpush3.bf16.msra.mxu0 %v419_v32  ;;  %v451_v26 = vpack.c.bf16 %v221_v25, %v219_v24  ;;  %v453_v37 = vpack.c.bf16 %v226_v36, %v224_v35  ;;  %v228_v41 = vld [vmem:[#allocation7 + $0xc8] sm:$0xff]  ;;  %v230_v42 = vld [vmem:[#allocation7 + $0xd8] sm:$0xff] }
  0x4d   :  { %422 = vmatprep.subr.bf16.mxu0 %v421_v33  ;;  %440 = vmatpush1.bf16.msra.mxu1 %v439_v10  ;;  %v457_v43 = vpack.c.bf16 %v230_v42, %v228_v41  ;;  %v232_v47 = vld [vmem:[#allocation7 + $0xe8] sm:$0xff] }
  0x4e   :  { %442 = vmatprep.subr.bf16.mxu1 %v441_v11 }
  0x50   :  { %424 = vmatpush3.bf16.msra.mxu0 %v423_v38  ;;  %v223_v38 = vld [vmem:[#allocation7 + $0xa0] sm:$0xff] }
  0x51   :  { %426 = vmatprep.subr.bf16.mxu0 %v425_v39  ;;  %444 = vmatpush1.bf16.msra.mxu1 %v443_v16  ;;  %v225_v39 = vld [vmem:[#allocation7 + $0xb0] sm:$0xff] }
  0x52   :  { %446 = vmatprep.subr.bf16.mxu1 %v445_v17  ;;  %v455_v40 = vpack.c.bf16 %v225_v39, %v223_v38 }
  0x54   :  { %428 = vmatpush3.bf16.msra.mxu0 %v427_v44  ;;  %v227_v44 = vld [vmem:[#allocation7 + $0xc0] sm:$0xff] }
  0x55   :  { %430 = vmatprep.subr.bf16.mxu0 %v429_v45  ;;  %448 = vmatpush1.bf16.msra.mxu1 %v447_v22  ;;  %v229_v45 = vld [vmem:[#allocation7 + $0xd0] sm:$0xff] }
  0x56   :  { %450 = vmatprep.subr.bf16.mxu1 %v449_v23  ;;  %v459_v46 = vpack.c.bf16 %v229_v45, %v227_v44 }
  0x58   :  { %432 = vmatpush3.bf16.msra.mxu0 %v431_v48  ;;  %v234_v48 = vld [vmem:[#allocation7 + $0xf8] sm:$0xff] }
  0x59   :  { %452 = vmatpush1.bf16.msra.mxu1 %v451_v26 }
  0x5a   :  { %454 = vmatprep.subr.bf16.mxu1 %v453_v37 }
  0x5b   :  { %173 = vmatmul.mubr.f32.vlgmr.msra.gmra.mrb[0].mxu0 %v65_v49  ;;  %v231_v49 = vld [vmem:[#allocation7 + $0xe0] sm:$0xff] }
  0x5c   :  { %177 = vmatprep.mubr.f32.mxu0 %v68_v50  ;;  %v461_v50 = vpack.c.bf16 %v234_v48, %v232_v47 }
  0x5d   :  { %456 = vmatpush1.bf16.msra.mxu1 %v455_v40 }
  0x5e   :  { %458 = vmatprep.subr.bf16.mxu1 %v457_v43 }
  0x5f   :  { %178 = vmatmul.mubr.f32.gmra.mrb[2].mxu0 %v67_v51  ;;  %v233_v51 = vld [vmem:[#allocation7 + $0xf0] sm:$0xff] }
  0x61   :  { %460 = vmatpush1.bf16.msra.mxu1 %v459_v46 }
  0x62   :  { %462 = vmatprep.subr.bf16.mxu1 %v461_v50 }
 0x12e   :  { %v395_v52 = vpop.f32.mrb[0].mxu0 }
 0x12f   :  { %v396_v53 = vpop.f32.mrb[1].mxu0 }
 0x130   :  { %v397_v55 = vadd.f32 %v396_v53, %v395_v52  ;;  %v608_v52 = vmov 0.0   ;;  %v463_v53 = vpack.c.bf16 %v233_v51, %v231_v49 }
 0x131   :  { %311 = vmatprep.mubr.f32.mxu1 %v608_v52 }
 0x132   :  { %v398_v56 = vpop.f32.mrb[2].mxu0  ;;  %v175_v57 = vadd.f32 %v397_v55, %v362_v54  ;;  %464 = vmatpush1.bf16.msra.mxu1 %v463_v53 }
 0x133   :  { %v399_v58 = vpop.f32.mrb[3].mxu0 }
 0x134   :  { %v400_v59 = vadd.f32 %v399_v58, %v398_v56  ;;  %183 = vmax.xlane.f32.xlu0 %v175_v57 }
 0x136   :  { %v180_v60 = vadd.f32 %v400_v59, %v362_v54 }
 0x138   :  { %185 = vmax.xlane.f32.xlu0 %v180_v60 }
 0x1c1   :  { %v184_v27 = vpop.xlane.xlu0 %183 }
 0x1c2   :  { %v187_v28 = vsub.f32 %v175_v57, %v184_v27 }
 0x1c4   :  { %v189_v29 = vmul.f32 1.442695, %v187_v28 }
 0x1c5   :  { %v186_v30 = vpop.xlane.xlu0 %185 }
 0x1c6   :  { %475 = vpow2.f32 %v189_v29  ;;  %v188_v31 = vsub.f32 %v180_v60, %v186_v30 }
 0x1c8   :  { %v191_v32 = vmul.f32 1.442695, %v188_v31 }
 0x1ca   :  { %477 = vpow2.f32 %v191_v32 }
 0x1d0   :  { %v476_v33 = vpop.eup %475 }
 0x1d1   :  { %193 = vadd.xlane.f32.xlu1 %v476_v33 }
 0x1d4   :  { %v478_v34 = vpop.eup %477 }
 0x1d5   :  { %195 = vadd.xlane.f32.xlu1 %v478_v34 }
 0x25e   :  { %v194_v54 = vpop.xlane.xlu1 %193 }
 0x25f   :  { %479 = vrcp.f32 %v194_v54 }
 0x262   :  { %v196_v55 = vpop.xlane.xlu1 %195 }
 0x263   :  { %481 = vrcp.f32 %v196_v55 }
 0x269   :  { %v480_v56 = vpop.eup %479 }
 0x26a   :  { %v198_v57 = vmul.f32 %v480_v56, %v476_v33 }
 0x26c   :  { %312 = vmatmul.mubr.f32.vlgmr.msra.gmra.mrb[0].mxu1 %v198_v57  ;;  %201 = vst [vmem:[#allocation9] sm:$0xff] %v198_v57 }
 0x26d   :  { %v482_v58 = vpop.eup %481  ;;  %317 = vmatprep.mubr.f32.mxu1 %v608_v52 }
 0x26e   :  { %v200_v59 = vmul.f32 %v482_v58, %v478_v34 }
 0x270   :  { %318 = vmatmul.mubr.f32.gmra.mrb[2].mxu1 %v200_v59  ;;  %202 = vst [vmem:[#allocation9 + $0x8] sm:$0xff] %v200_v59 }
 0x271   :  { %560 = shalt.err (!%p557_p0)
}
 0x272   :  { %s561_s18 = scalar_lea.hbm %s733_s6, 256 }
 0x273   :  { %p562_p1 = scmp.ne.s32.totalorder %s733_s6, %s561_s18  ;;  %p565_p2 = scmp.lt.u32.totalorder %s561_s18, %s733_s6 }
 0x275   :  { %p567_p3 = pnand %p565_p2, %p562_p1 }
 0x277   :  { %570 = shalt.err (!%p567_p3)
}
 0x278   :  { %351 = dma.vmem_to_hbm [thread:$0]  %s346_s14, 256, %s733_s6, [#allocation10], %s602_s7, %s602_s7, %s603_s8   ;;  %v237_v60 = vlaneseq }
 0x279   :  { %v235_v63 = vld [vmem:[%s731_s4] sm:$0x3]  ;;  %s610_s28 = smov [#allocation8]  }
 0x27a   :  { %v238_v61 = vshrl.u32 %v237_v60, 7  ;;  %s333_s29 = sshll.u32 %s610_s28, 4  ;;  %s334_s29 = int_to_ptr.vmem [resolvable:$true] %s333_s29 }
 0x27b   :  { %s571_s6 = scalar_lea.vmem %s334_s29, 512  ;;  %p576_p5 = scmp.lt.s32.totalorder %s334_s29, %s334_s29 }
 0x27c   :  { %v239_v62 = vsub.s32 0, %v238_v61  ;;  %v243_v0 = vsub.s32 1, %v238_v61  ;;  %p572_p4 = scmp.ne.s32.totalorder %s334_s29, %s571_s6  ;;  %p577_p6 = scmp.lt.s32.totalorder %s571_s6, %s571_s6 }
 0x27e   :  { %v240_v1 = vrot.slane %v235_v63, %v239_v62  ;;  %v244_v2 = vrot.slane %v235_v63, %v243_v0  ;;  %p578_p7 = por %p577_p6, %p576_p5 }
 0x280   :  { %p579_p8 = pnand %p578_p7, %p572_p4 }
 0x33f   :  { %v313_v3 = vpop.f32.mrb[0].mxu1 }
 0x340   :  { %v314_v4 = vadd.f32 %v313_v3, %v240_v1  ;;  %v315_v5 = vpop.f32.mrb[1].mxu1 }
 0x341   :  { %v316_v6 = vadd.f32 %v315_v5, %v244_v2 }
 0x342   :  { %324 = vst [vmem:[#allocation8] sm:$0xff] %v314_v4 }
 0x343   :  { %325 = vst [vmem:[#allocation8 + $0x8] sm:$0xff] %v316_v6  ;;  %v319_v7 = vpop.f32.mrb[2].mxu1 }
 0x344   :  { %v320_v8 = vadd.f32 %v319_v7, %v240_v1  ;;  %v321_v9 = vpop.f32.mrb[3].mxu1 }
 0x345   :  { %v322_v10 = vadd.f32 %v321_v9, %v244_v2 }
 0x346   :  { %326 = vst [vmem:[#allocation8 + $0x10] sm:$0xff] %v320_v8 }
 0x347   :  { %327 = vst [vmem:[#allocation8 + $0x18] sm:$0xff] %v322_v10 }
 0x348   :  { %582 = shalt.err (!%p579_p8)
}
 0x349   :  { %s583_s8 = scalar_lea.hbm %s732_s5, 512 }
 0x34a   :  { %p584_p9 = scmp.ne.s32.totalorder %s732_s5, %s583_s8  ;;  %p587_p10 = scmp.lt.u32.totalorder %s583_s8, %s732_s5 }
 0x34c   :  { %p589_p11 = pnand %p587_p10, %p584_p9 }
 0x34e   :  { %592 = shalt.err (!%p589_p11)
}
 0x34f   :  { %339 = dma.vmem_to_hbm [thread:$0]  %s334_s29, 512, %s732_s5, [#allocation4], %s605_s1, %s605_s1, %s606_s21  }
 0x350   :  { %597 = dma.done.wait [#allocation4], 512  }
 0x351   :  { %598 = vsyncadd [#allocation4], 4294966784 }
 0x352   :  { %599 = dma.done.wait [#allocation10], 256  }
 0x353   :  { %600 = vsyncadd [#allocation10], 4294967040 }
 0x354   :  { %358 = vsyncpa [#allocation3], 1 }
 0x355   :  { %359 = vsyncpa [#allocation6], 1 }
 0x356   :  { %360 = vsyncpa [#allocation4], 1 }
 0x357   :  { %361 = vsyncpa [#allocation10], 1 }

</bundles_post_ra>
